<compile_context>
chip_gen: v7x
topology: tpu7x:2x2x1
jax: 0.10.0
libtpu: 0.0.40
codegen_flags: <defaults>
</compile_context>

<pallas_src>
import jax
import jax.numpy as jnp
from jax import lax
from jax.experimental import pallas as pl
from jax.experimental.pallas import tpu as pltpu


def ff_kernel(x_ref, w2_ref, w5_ref, bn0_ref, b3_ref, out_ref):
  """Feed-forward branch of TransformerQuantBrevitas (the value it returns).

  x_ref   : (B*S, C)  fp32   positions packed on the sublane axis
  w2_ref  : (C, 2C)   bf16   linear_2 weight (transposed; BN3 scale folded in)
  w5_ref  : (2C, C)   bf16   linear_5 weight (transposed)
  bn0_ref : (2, C)    fp32   row 0 = linear_0 BN scale, row 1 = shift (eval)
  b3_ref  : (1, 2C)   fp32   linear_3 BN shift (eval; scale folded into w2)
  out_ref : (B*S, C)  fp32
  """
  x = x_ref[...]                                               # (BS, C)
  h = x * bn0_ref[0:1] + bn0_ref[1:2]                          # linear_0 (BN)
  h = jnp.maximum(h, 0.0)                                      # linear_1 (ReLU)
  h = jnp.dot(h.astype(jnp.bfloat16), w2_ref[...],
              preferred_element_type=jnp.float32)              # linear_2 (+BN3 scale)
  h = h + b3_ref[...]                                          # linear_3 (BN shift)
  h = jnp.maximum(h, 0.0)                                      # linear_4 (ReLU)
  h = jnp.dot(h.astype(jnp.bfloat16), w5_ref[...],
              preferred_element_type=jnp.float32)              # linear_5
  out_ref[...] = (x + h).astype(out_ref.dtype)                 # residual


def transformer_forward(x, params):
  """Forward pass of TransformerQuantBrevitas (eval mode)."""
  B, S, C = x.shape
  (_wq, _wk, _wv, _wo, w2, w5,
   _sa_s, _sa_b, _pe_s, _pe_b,
   bn0_s, bn0_b, bn3_s, bn3_b) = params
  # NOTE: the self-attention parameters are intentionally unused — the PyTorch
  # forward discards that branch, so it contributes nothing to the output.

  x2 = x.reshape(B * S, C)                        # positions -> sublane axis
  bn0 = jnp.concatenate([bn0_s, bn0_b], axis=0)   # (2, C): [scale; shift]
  w2f = (w2 * bn3_s).astype(jnp.bfloat16)         # fold BN3 scale into linear_2
  w5b = w5.astype(jnp.bfloat16)

  vmem = pl.BlockSpec(memory_space=pltpu.MemorySpace.VMEM)
  out2 = pl.pallas_call(
      ff_kernel,
      out_shape=jax.ShapeDtypeStruct((B * S, C), x.dtype),
      in_specs=[vmem, vmem, vmem, vmem, vmem],
      out_specs=vmem,
  )(x2, w2f, w5b, bn0, bn3_b)
  return out2.reshape(B, S, C)


# ---------------------------- parameter construction ----------------------------
def _bn_eval_affine(key, n, eps=1e-5):
  k1, k2, k3, k4 = jax.random.split(key, 4)
  gamma = 1.0 + 0.1 * jax.random.normal(k1, (n,), jnp.float32)
  beta = 0.1 * jax.random.normal(k2, (n,), jnp.float32)
  mean = 0.1 * jax.random.normal(k3, (n,), jnp.float32)
  var = 0.5 + jnp.abs(jax.random.normal(k4, (n,), jnp.float32))
  scale = gamma * lax.rsqrt(var + eps)
  shift = beta - mean * scale
  return scale, shift


def make_params(key, in_dim, seq_len):
  """Full module parameter set (SA params included for fidelity; unused)."""
  C, S = in_dim, seq_len
  ks = jax.random.split(key, 10)

  def lin_w(k, n_in, n_out):
    # nn.Linear weight is (out, in); stored transposed (in, out) for x @ W.
    return (jax.random.normal(k, (n_out, n_in), jnp.float32) / jnp.sqrt(n_in)).T

  wq = lin_w(ks[0], C, C)
  wk = lin_w(ks[1], C, C)
  wv = lin_w(ks[2], C, C)
  wo = lin_w(ks[3], C, C)
  w2 = lin_w(ks[4], C, 2 * C)
  w5 = lin_w(ks[5], 2 * C, C)

  sa_s, sa_b = _bn_eval_affine(ks[6], C)          # SelfAttention.norm
  pe_s, pe_b = _bn_eval_affine(ks[7], S * S)      # pre_exp_norm
  bn0_s, bn0_b = _bn_eval_affine(ks[8], C)        # linear_0
  bn3_s, bn3_b = _bn_eval_affine(ks[9], 2 * C)    # linear_3

  return (wq, wk, wv, wo, w2, w5,
          sa_s.reshape(1, C), sa_b.reshape(1, C),
          pe_s.reshape(S, S), pe_b.reshape(S, S),
          bn0_s.reshape(1, C), bn0_b.reshape(1, C),
          bn3_s.reshape(1, 2 * C), bn3_b.reshape(1, 2 * C))


# ---------------------------- pure-JAX reference --------------------------------
def reference_forward(x, params):
  (_wq, _wk, _wv, _wo, w2, w5,
   _sa_s, _sa_b, _pe_s, _pe_b,
   bn0_s, bn0_b, bn3_s, bn3_b) = params
  # Self-attention branch is discarded by the module's forward -> skipped.
  h = jnp.maximum(x * bn0_s + bn0_b, 0.0) @ w2
  h = jnp.maximum(h * bn3_s + bn3_b, 0.0) @ w5
  return x + h


if __name__ == "__main__":
  B = 2
  S = 31           # num_particles + 1 (fixed by the module's pre_exp_norm)
  C = 32           # in_dim

  key = jax.random.PRNGKey(0)
  kx, kp = jax.random.split(key)
  x = jax.random.normal(kx, (B, S, C), jnp.float32)
  params = make_params(kp, C, S)

  out = jax.block_until_ready(transformer_forward(x, params))
  ref = reference_forward(x, params)

  assert out.shape == (B, S, C)
  # bf16 MXU operands with fp32 accumulation vs fp32 reference.
  assert jnp.allclose(out, ref, rtol=1e-2, atol=2e-2), "mismatch vs JAX reference"
  print("KERNEL_OK")
</pallas_src>

<mosaic_0001>
module attributes {stable_mosaic.version = 11 : i64} {
  func.func @ff_kernel(%arg0: memref<62x32xf32, #tpu.memory_space<vmem>>, %arg1: memref<32x64xbf16, #tpu.memory_space<vmem>>, %arg2: memref<64x32xbf16, #tpu.memory_space<vmem>>, %arg3: memref<2x32xf32, #tpu.memory_space<vmem>>, %arg4: memref<1x64xf32, #tpu.memory_space<vmem>>, %arg5: memref<62x32xf32, #tpu.memory_space<vmem>>) attributes {dimension_semantics = [], scalar_prefetch = 0 : i64, scratch_operands = 0 : i64, tpu.core_type = #tpu.core_type<tc>} {
    %c0 = arith.constant 0 : index
    %c0_0 = arith.constant 0 : index
    %0 = vector.load %arg0[%c0, %c0_0] : memref<62x32xf32, #tpu.memory_space<vmem>>, vector<62x32xf32>
    %c0_1 = arith.constant 0 : index
    %c0_2 = arith.constant 0 : index
    %1 = vector.load %arg3[%c0_1, %c0_2] : memref<2x32xf32, #tpu.memory_space<vmem>>, vector<1x32xf32>
    %2 = vector.broadcast %1 : vector<1x32xf32> to vector<62x32xf32>
    %3 = arith.mulf %0, %2 : vector<62x32xf32>
    %c1 = arith.constant 1 : index
    %c0_3 = arith.constant 0 : index
    %4 = vector.load %arg3[%c1, %c0_3] : memref<2x32xf32, #tpu.memory_space<vmem>>, vector<1x32xf32>
    %5 = vector.broadcast %4 : vector<1x32xf32> to vector<62x32xf32>
    %6 = arith.addf %3, %5 : vector<62x32xf32>
    %cst = arith.constant 0.000000e+00 : f32
    %7 = vector.broadcast %cst : f32 to vector<62x32xf32>
    %8 = arith.maximumf %6, %7 : vector<62x32xf32>
    %9 = arith.truncf %8 : vector<62x32xf32> to vector<62x32xbf16>
    %c0_4 = arith.constant 0 : index
    %c0_5 = arith.constant 0 : index
    %10 = vector.load %arg1[%c0_4, %c0_5] : memref<32x64xbf16, #tpu.memory_space<vmem>>, vector<32x64xbf16>
    %cst_6 = arith.constant dense<0.000000e+00> : vector<62x64xf32>
    %11 = tpu.matmul %9, %10, %cst_6 {dimension_numbers = #tpu.dot_dimension_numbers<[1], [0], [0], [1], [0, 0, 1, 1], [], []>} : vector<62x32xbf16>, vector<32x64xbf16>, vector<62x64xf32> -> vector<62x64xf32>
    %c0_7 = arith.constant 0 : index
    %c0_8 = arith.constant 0 : index
    %12 = vector.load %arg4[%c0_7, %c0_8] : memref<1x64xf32, #tpu.memory_space<vmem>>, vector<1x64xf32>
    %13 = vector.broadcast %12 : vector<1x64xf32> to vector<62x64xf32>
    %14 = arith.addf %11, %13 : vector<62x64xf32>
    %cst_9 = arith.constant 0.000000e+00 : f32
    %15 = vector.broadcast %cst_9 : f32 to vector<62x64xf32>
    %16 = arith.maximumf %14, %15 : vector<62x64xf32>
    %17 = arith.truncf %16 : vector<62x64xf32> to vector<62x64xbf16>
    %c0_10 = arith.constant 0 : index
    %c0_11 = arith.constant 0 : index
    %18 = vector.load %arg2[%c0_10, %c0_11] : memref<64x32xbf16, #tpu.memory_space<vmem>>, vector<64x32xbf16>
    %cst_12 = arith.constant dense<0.000000e+00> : vector<62x32xf32>
    %19 = tpu.matmul %17, %18, %cst_12 {dimension_numbers = #tpu.dot_dimension_numbers<[1], [0], [0], [1], [0, 0, 1, 1], [], []>} : vector<62x64xbf16>, vector<64x32xbf16>, vector<62x32xf32> -> vector<62x32xf32>
    %20 = arith.addf %0, %19 : vector<62x32xf32>
    %c0_13 = arith.constant 0 : index
    %c0_14 = arith.constant 0 : index
    %21 = vector.load %arg5[%c0_13, %c0_14] : memref<62x32xf32, #tpu.memory_space<vmem>>, vector<62x32xf32>
    tpu.vector_store %arg5[%c0_13, %c0_14], %20 {strides = array<i32>} : memref<62x32xf32, #tpu.memory_space<vmem>>, vector<62x32xf32>,
    return
  }
}

</mosaic_0001>

<bundles_post_ra>
// kernel: tpu_custom_call.1
= control target key start
LH: loop header
LB: loop body
LE: loop exit
PB: predicated region body
PF: predicated region fallthrough
CT: control target
= control target key end

     0   :  { %vm90_vm0 = vcmask 261120   ;;  %vm212_vm1 = vcmask 523264   ;;  %vm305_vm2 = vcmask 259072   ;;  %s528_s1 = inlined_call_operand.vmem [shape: bf16[32,64], index: 1, kind: input, shape index: {}]   ;;  %s529_s0 = inlined_call_operand.vmem [shape: f32[62,32], index: 0, kind: input, shape index: {}]   ;;  %s530_s3 = inlined_call_operand.vmem [shape: f32[2,32], index: 3, kind: input, shape index: {}]   ;;  %s531_s2 = inlined_call_operand.vmem [shape: bf16[64,32], index: 2, kind: input, shape index: {}]   ;;  %s532_s4 = inlined_call_operand.vmem [shape: f32[1,64], index: 4, kind: input, shape index: {}]   ;;  %s533_s5 = inlined_call_operand.vmem [shape: f32[62,32], index: 5, kind: output, shape index: {}]  }
   0x1   :  { %v370_v0 = vld [vmem:[%s528_s1] sm:$0xff]   ;;  %v371_v1 = vld [vmem:[%s528_s1 + $0x8] sm:$0xff]   ;;  %v433_v8 = vld [vmem:[%s529_s0 + $0x10] sm:$0xff] }
   0x2   :  { %342 = vmatprep.subr.bf16.mxu0 %v370_v0  ;;  %v415_v2 = vld [vmem:[%s529_s0] sm:$0xff]  ;;  %v420_v3 = vld [vmem:[%s529_s0 + $0x8] sm:$0xff]  ;;  %v438_v9 = vld [vmem:[%s529_s0 + $0x18] sm:$0xff] }
   0x3   :  { %v311_v4 = vld [vmem:[%s530_s3] ss:$0 sm:$0xff]  ;;  %343 = vmatpush3.bf16.msra.mxu0 %v370_v0  ;;  %v312_v7 = vld [vmem:[%s530_s3 + $0x1] ss:$0 sm:$0xff]  ;;  %v450_v13 = vld [vmem:[%s529_s0 + $0x28] sm:$0xff] }
   0x4   :  { %v34_v5 = vmul.f32 %v311_v4, %v415_v2  ;;  %v35_v6 = vmul.f32 %v311_v4, %v420_v3  ;;  %344 = vmatprep.subr.bf16.mxu0 %v371_v1  ;;  %v36_v10 = vmul.f32 %v311_v4, %v433_v8  ;;  %v37_v11 = vmul.f32 %v311_v4, %v438_v9  ;;  %v445_v12 = vld [vmem:[%s529_s0 + $0x20] sm:$0xff]  ;;  %v455_v14 = vld [vmem:[%s529_s0 + $0x30] sm:$0xff]  ;;  %v462_v19 = vld [vmem:[%s529_s0 + $0x38] sm:$0x3f] }
   0x5   :  { %v38_v17 = vmul.f32 %v311_v4, %v445_v12  ;;  %v39_v18 = vmul.f32 %v311_v4, %v450_v13  ;;  %v40_v22 = vmul.f32 %v311_v4, %v455_v14  ;;  %v41_v23 = vmul.f32 %v311_v4, %v462_v19  ;;  %v372_v24 = vld [vmem:[%s531_s2] sm:$0xff]   ;;  %v373_v29 = vld [vmem:[%s531_s2 + $0x8] sm:$0xff]   ;;  %v374_v42 = vld [vmem:[%s531_s2 + $0x10] sm:$0xff]  }
   0x6   :  { %v47_v15 = vadd.f32 %v312_v7, %v34_v5  ;;  %v48_v16 = vadd.f32 %v312_v7, %v35_v6  ;;  %v49_v20 = vadd.f32 %v312_v7, %v36_v10  ;;  %v50_v21 = vadd.f32 %v312_v7, %v37_v11  ;;  %354 = vmatprep.subr.bf16.mxu1 %v372_v24  ;;  %v375_v43 = vld [vmem:[%s531_s2 + $0x18] sm:$0xff]   ;;  %v313_v44 = vld [vmem:[%s532_s4] ss:$0 sm:$0xff] }
   0x7   :  { %345 = vmatpush3.bf16.msra.mxu0 %v371_v1  ;;  %v51_v27 = vadd.f32 %v312_v7, %v38_v17  ;;  %v52_v28 = vadd.f32 %v312_v7, %v39_v18  ;;  %v53_v32 = vadd.f32 %v312_v7, %v40_v22  ;;  %v54_v33 = vadd.f32 %v312_v7, %v41_v23 }
   0x8   :  { %v55_v25 = vmax.f32 %v47_v15, 0.0  ;;  %v56_v26 = vmax.f32 %v48_v16, 0.0  ;;  %v57_v30 = vmax.f32 %v49_v20, 0.0  ;;  %v58_v31 = vmax.f32 %v50_v21, 0.0  ;;  %355 = vmatpush3.bf16.msra.mxu1 %v372_v24 }
   0x9   :  { %v59_v35 = vmax.f32 %v51_v27, 0.0  ;;  %v60_v36 = vmax.f32 %v52_v28, 0.0  ;;  %356 = vmatprep.subr.bf16.mxu1 %v373_v29  ;;  %v61_v39 = vmax.f32 %v53_v32, 0.0  ;;  %v62_v40 = vmax.f32 %v54_v33, 0.0 }
   0xa   :  { %v63_v34 = vpack.c.bf16 %v56_v26, %v55_v25  ;;  %v64_v37 = vpack.c.bf16 %v58_v31, %v57_v30 }
   0xb   :  { %v65_v38 = vpack.c.bf16 %v60_v36, %v59_v35  ;;  %v66_v41 = vpack.c.bf16 %v62_v40, %v61_v39 }
   0xc   :  { %346 = vmatprep.mubr.msk.bf16.mxu0 %vm90_vm0, %v63_v34  ;;  %357 = vmatpush3.bf16.msra.mxu1 %v373_v29 }
   0xd   :  { %347 = vmatmul.mubr.msk.bf16.vlgmr.msra.gmra.mrb[0].mxu0 %vm90_vm0, %v64_v37  ;;  %358 = vmatprep.subr.bf16.mxu1 %v374_v42 }
   0xe   :  { %350 = vmatprep.mubr.msk.bf16.mxu0 %vm90_vm0, %v65_v38 }
  0x10   :  { %359 = vmatpush3.bf16.msra.mxu1 %v374_v42 }
  0x11   :  { %360 = vmatprep.subr.bf16.mxu1 %v375_v43 }
  0x14   :  { %361 = vmatpush3.bf16.msra.mxu1 %v375_v43 }
  0x15   :  { %351 = vmatmul.mubr.msk.bf16.gmra.mrb[4].mxu0 %vm90_vm0, %v66_v41 }
  0xe0   :  { %v348_v45 = vpop.f32.mrb[0].mxu0 }
  0xe1   :  { %v146_v46 = vadd.f32 %v348_v45, %v313_v44  ;;  %v137_v47 = vpop.f32.mrb[1].mxu0 }
  0xe2   :  { %v138_v48 = vadd.f32 %v313_v44, %v137_v47  ;;  %v349_v49 = vpop.f32.mrb[2].mxu0 }
  0xe3   :  { %v149_v50 = vadd.f32 %v349_v49, %v313_v44  ;;  %v140_v51 = vpop.f32.mrb[3].mxu0  ;;  %v170_v53 = vmax.f32 %v146_v46, 0.0 }
  0xe4   :  { %v141_v52 = vadd.f32 %v313_v44, %v140_v51  ;;  %v168_v55 = vmax.f32 %v138_v48, 0.0 }
  0xe5   :  { %v171_v54 = vmax.f32 %v149_v50, 0.0 }
  0xe6   :  { %v169_v56 = vmax.f32 %v141_v52, 0.0 }
  0xe7   :  { %v177_v57 = vpack.c.bf16 %v171_v54, %v170_v53 }
  0xe8   :  { %v352_v58 = vpop.f32.mrb[4].mxu0  ;;  %v176_v59 = vpack.c.bf16 %v169_v56, %v168_v55 }
  0xe9   :  { %v162_v60 = vadd.f32 %v352_v58, %v313_v44  ;;  %v153_v61 = vpop.f32.mrb[5].mxu0 }
  0xea   :  { %v154_v62 = vadd.f32 %v313_v44, %v153_v61  ;;  %v353_v63 = vpop.f32.mrb[6].mxu0  ;;  %362 = vmatprep.mubr.msk.bf16.mxu1 %vm212_vm1, %v176_v59 }
  0xeb   :  { %v165_v0 = vadd.f32 %v353_v63, %v313_v44  ;;  %v156_v1 = vpop.f32.mrb[7].mxu0  ;;  %363 = vmatmul.mubr.msk.bf16.vlgmr.msra.gmra.mrb[0].mxu1 %vm212_vm1, %v177_v57  ;;  %v174_v5 = vmax.f32 %v162_v60, 0.0 }
  0xec   :  { %v157_v4 = vadd.f32 %v313_v44, %v156_v1  ;;  %v172_v7 = vmax.f32 %v154_v62, 0.0 }
  0xed   :  { %v175_v6 = vmax.f32 %v165_v0, 0.0 }
  0xee   :  { %v173_v10 = vmax.f32 %v157_v4, 0.0 }
  0xef   :  { %v179_v11 = vpack.c.bf16 %v175_v6, %v174_v5 }
  0xf0   :  { %v178_v15 = vpack.c.bf16 %v173_v10, %v172_v7 }
  0xf2   :  { %366 = vmatprep.mubr.msk.bf16.mxu1 %vm212_vm1, %v178_v15 }
  0xf3   :  { %367 = vmatmul.mubr.msk.bf16.gmra.mrb[4].mxu1 %vm212_vm1, %v179_v11 }
 0x1be   :  { %v364_v16 = vpop.f32.mrb[0].mxu1 }
 0x1bf   :  { %v292_v17 = vadd.f32 %v364_v16, %v433_v8  ;;  %v259_v18 = vpop.f32.mrb[1].mxu1 }
 0x1c0   :  { %v290_v20 = vadd.f32 %v259_v18, %v415_v2  ;;  %v365_v21 = vpop.f32.mrb[2].mxu1 }
 0x1c1   :  { %300 = vst.msk [vmem:[%s533_s5 + $0x10] sm:$0xff] %vm90_vm0, %v292_v17  ;;  %v293_v22 = vadd.f32 %v365_v21, %v438_v9  ;;  %v262_v23 = vpop.f32.mrb[3].mxu1 }
 0x1c2   :  { %298 = vst.msk [vmem:[%s533_s5] sm:$0xff] %vm90_vm0, %v290_v20  ;;  %v291_v24 = vadd.f32 %v262_v23, %v420_v3 }
 0x1c3   :  { %301 = vst.msk [vmem:[%s533_s5 + $0x18] sm:$0xff] %vm90_vm0, %v293_v22 }
 0x1c4   :  { %299 = vst.msk [vmem:[%s533_s5 + $0x8] sm:$0xff] %vm90_vm0, %v291_v24 }
 0x1c6   :  { %v368_v2 = vpop.f32.mrb[4].mxu1 }
 0x1c7   :  { %v296_v8 = vadd.f32 %v368_v2, %v455_v14  ;;  %v275_v9 = vpop.f32.mrb[5].mxu1 }
 0x1c8   :  { %v294_v25 = vadd.f32 %v275_v9, %v445_v12  ;;  %v369_v26 = vpop.f32.mrb[6].mxu1 }
 0x1c9   :  { %304 = vst.msk [vmem:[%s533_s5 + $0x30] sm:$0xff] %vm90_vm0, %v296_v8  ;;  %v297_v3 = vadd.f32 %v369_v26, %v462_v19  ;;  %v278_v27 = vpop.f32.mrb[7].mxu1 }
 0x1ca   :  { %302 = vst.msk [vmem:[%s533_s5 + $0x20] sm:$0xff] %vm90_vm0, %v294_v25  ;;  %v295_v14 = vadd.f32 %v278_v27, %v450_v13 }
 0x1cb   :  { %306 = vst.msk [vmem:[%s533_s5 + $0x38] sm:$0x3f] %vm305_vm2, %v297_v3 }
 0x1cc   :  { %303 = vst.msk [vmem:[%s533_s5 + $0x28] sm:$0xff] %vm90_vm0, %v295_v14 }

</bundles_post_ra>
